<compile_context>
chip_gen: v7x
topology: tpu7x:2x2x1
jax: 0.10.0
libtpu: 0.0.40
codegen_flags: <defaults>
</compile_context>

<pallas_src>
import jax
import jax.numpy as jnp
from jax.experimental import pallas as pl
from jax.experimental.pallas import tpu as pltpu

EPS = 1e-5
D_PAD = 128       # lane-dense padded feature width for all dense layers
N_VEC_ROWS = 16   # sublane-padded row count of the packed vector slab

# Row indices inside V_all
_B1, _G1, _BE1, _B2, _G2, _BE2, _BA, _GA, _BEA, _BB, _GB, _BEB, _BO = range(13)
# Slab indices inside W_all
_W1, _W2, _WA, _WB, _WO = range(5)


def symeqnet_kernel(pa_ref, x_ref, w_ref, v_ref, out_ref):
    # SimpleConv + global_mean_pool fused:  pooled = (P @ A) @ X
    pooled = jnp.dot(pa_ref[...], x_ref[...], preferred_element_type=jnp.float32)

    def vec(i):                      # (1, D_PAD) row of the packed vector slab
        return v_ref[i:i + 1, :]

    def linear(x, wi, bi):           # x @ W[wi] + b[bi]   (zero-padded slabs)
        return jnp.dot(x, w_ref[wi], preferred_element_type=jnp.float32) + vec(bi)

    def bn(x, gi, bi):
        # BatchNorm1d, training semantics: batch mean, biased variance.
        # Single-pass stats (var = E[x^2] - mu^2) -> one fewer XLU reduction.
        mu = jnp.mean(x, axis=0, keepdims=True)
        ex2 = jnp.mean(x * x, axis=0, keepdims=True)
        var = jnp.maximum(ex2 - mu * mu, 0.0)
        return (x - mu) * jax.lax.rsqrt(var + EPS) * vec(gi) + vec(bi)

    # fc1 -> bn1 -> relu
    x1 = jnp.maximum(bn(linear(pooled, _W1, _B1), _G1, _BE1), 0.0)
    # fc2 -> bn2 -> relu
    x2 = jnp.maximum(bn(linear(x1, _W2, _B2), _G2, _BE2), 0.0)
    # one ResNet block (batch_norm=True path)
    res = x2
    y = jnp.maximum(bn(linear(x2, _WA, _BA), _GA, _BEA), 0.0)
    y = bn(linear(y, _WB, _BB), _GB, _BEB)
    y = jnp.maximum(y + res, 0.0)
    # fc_out: real scalar lands in lane 0; padded wo/bo columns keep lanes 1.. at 0
    out_ref[...] = linear(y, _WO, _BO)


def pack_params(params):
    """Pack 18 tiny parameter arrays into two lane-dense, zero-padded slabs."""
    (w1, b1, g1, be1, w2, b2, g2, be2,
     wa, ba, ga, bea, wb, bb, gb, beb, wo, bo) = params

    def pad_w(w):
        out = jnp.zeros((D_PAD, D_PAD), jnp.float32)
        return out.at[:w.shape[0], :w.shape[1]].set(w)

    def pad_v(v):
        v = v.reshape(-1)
        out = jnp.zeros((D_PAD,), jnp.float32)
        return out.at[:v.shape[0]].set(v)

    W_all = jnp.stack([pad_w(w) for w in (w1, w2, wa, wb, wo)], axis=0)
    rows = [b1, g1, be1, b2, g2, be2, ba, ga, bea, bb, gb, beb, bo]
    V = jnp.stack([pad_v(v) for v in rows], axis=0)
    V_all = jnp.zeros((N_VEC_ROWS, D_PAD), jnp.float32).at[:len(rows)].set(V)
    return W_all, V_all


def symeqnet_forward(PA, X, W_all, V_all):
    """PA: [G, N] fused pool*adjacency, X: [N, F] node features (F <= D_PAD)."""
    G = PA.shape[0]
    # Lane-dense, zero-padded node features (padding lanes stay 0 end-to-end).
    Xp = jnp.zeros((X.shape[0], D_PAD), jnp.float32).at[:, :X.shape[1]].set(X)
    args = (PA, Xp, W_all, V_all)

    def full_spec(arr):
        nd = arr.ndim
        return pl.BlockSpec(arr.shape, (lambda n: (lambda i: (0,) * n))(nd))

    out = pl.pallas_call(
        symeqnet_kernel,
        out_shape=jax.ShapeDtypeStruct((G, D_PAD), jnp.float32),
        grid=(1,),
        in_specs=[full_spec(a) for a in args],
        out_specs=pl.BlockSpec((G, D_PAD), lambda i: (0, 0)),
        compiler_params=pltpu.CompilerParams(
            dimension_semantics=("arbitrary",)),
    )(*args)
    return out[:, :1]


def reference_forward(A, P, X, params):
    (w1, b1, g1, be1, w2, b2, g2, be2,
     wa, ba, ga, bea, wb, bb, gb, beb, wo, bo) = params

    def bn(x, gamma, beta):
        mu = x.mean(0, keepdims=True)
        var = ((x - mu) ** 2).mean(0, keepdims=True)
        return (x - mu) / jnp.sqrt(var + EPS) * gamma + beta

    h = A @ X
    p = P @ h
    x1 = jax.nn.relu(bn(p @ w1 + b1, g1, be1))
    x2 = jax.nn.relu(bn(x1 @ w2 + b2, g2, be2))
    y = jax.nn.relu(bn(x2 @ wa + ba, ga, bea))
    y = bn(y @ wb + bb, gb, beb)
    y = jax.nn.relu(y + x2)
    return y @ wo + bo


if __name__ == "__main__":
    # Model hyper-params (SimpleConv keeps feature dim = node_features_size)
    F_NODE = 9      # node_features_size
    H1 = 10         # h1_dim
    R = 10          # resnet_dim (num_resnet_blocks = 1, batch_norm = True)

    # Graph data sizes
    N_NODES = 16
    N_GRAPHS = 4
    N_EDGES = 24

    key = jax.random.PRNGKey(0)
    keys = jax.random.split(key, 24)

    # --- deterministic graph inputs (PyG-style) ------------------------------
    x = jax.random.normal(keys[0], (N_NODES, F_NODE), dtype=jnp.float32)
    src = jax.random.randint(keys[1], (N_EDGES,), 0, N_NODES)
    dst = jax.random.randint(keys[2], (N_EDGES,), 0, N_NODES)
    edge_index = jnp.stack([src, dst], axis=0)                       # [2, E]
    edge_attr = jax.random.uniform(keys[3], (N_EDGES,), dtype=jnp.float32)
    batch = jnp.repeat(jnp.arange(N_GRAPHS), N_NODES // N_GRAPHS)    # [N]

    # Dense adjacency A[dst, src] += edge_attr  (SimpleConv with edge weights)
    A = jnp.zeros((N_NODES, N_NODES), jnp.float32).at[
        edge_index[1], edge_index[0]].add(edge_attr)
    # Mean-pool matrix P[g, n] = 1/|g| if batch[n] == g
    onehot = (batch[None, :] == jnp.arange(N_GRAPHS)[:, None]).astype(jnp.float32)
    counts = jnp.maximum(onehot.sum(axis=1, keepdims=True), 1.0)
    P = onehot / counts
    # Fused pooling*adjacency: pooled = (P @ A) @ X inside the kernel.
    PA = P @ A                                                        # [G, N]

    # --- deterministic parameters (Linear weights stored as [in, out]) -------
    def lin(kw, kb, d_in, d_out):
        w = 0.2 * jax.random.normal(kw, (d_in, d_out), dtype=jnp.float32)
        b = 0.1 * jax.random.normal(kb, (1, d_out), dtype=jnp.float32)
        return w, b

    def bn_params(kg, kb, d):
        g = 1.0 + 0.1 * jax.random.normal(kg, (1, d), dtype=jnp.float32)
        b = 0.1 * jax.random.normal(kb, (1, d), dtype=jnp.float32)
        return g, b

    w1, b1 = lin(keys[4], keys[5], F_NODE, H1)
    g1, be1 = bn_params(keys[6], keys[7], H1)
    w2, b2 = lin(keys[8], keys[9], H1, R)
    g2, be2 = bn_params(keys[10], keys[11], R)
    wa, ba = lin(keys[12], keys[13], R, R)       # res_fc1
    ga, bea = bn_params(keys[14], keys[15], R)   # res_bn1
    wb, bb = lin(keys[16], keys[17], R, R)       # res_fc2
    gb, beb = bn_params(keys[18], keys[19], R)   # res_bn2
    wo, bo = lin(keys[20], keys[21], R, 1)       # fc_out

    params = (w1, b1, g1, be1, w2, b2, g2, be2,
              wa, ba, ga, bea, wb, bb, gb, beb, wo, bo)

    W_all, V_all = pack_params(params)

    out = symeqnet_forward(PA, x, W_all, V_all)
    out = jax.block_until_ready(out)

    ref = reference_forward(A, P, x, params)
    assert out.shape == (N_GRAPHS, 1)
    assert jnp.allclose(out, ref, rtol=1e-4, atol=1e-4), (out, ref)

    print("KERNEL_OK")
</pallas_src>

<mosaic_0001>
module attributes {stable_mosaic.version = 11 : i64} {
  func.func @symeqnet_kernel(%arg0: i32, %arg1: memref<4x16xf32, #tpu.memory_space<vmem>>, %arg2: memref<16x128xf32, #tpu.memory_space<vmem>>, %arg3: memref<5x128x128xf32, #tpu.memory_space<vmem>>, %arg4: memref<16x128xf32, #tpu.memory_space<vmem>>, %arg5: memref<4x128xf32, #tpu.memory_space<vmem>>) attributes {dimension_semantics = [#tpu.dimension_semantics<arbitrary>], iteration_bounds = array<i64: 1>, scalar_prefetch = 0 : i64, scratch_operands = 0 : i64, tpu.core_type = #tpu.core_type<tc>, window_params = [{pipeline_mode = #tpu.pipeline_mode<synchronous>, transform_indices = @transform_0, window_bounds = array<i64: 4, 16>}, {pipeline_mode = #tpu.pipeline_mode<synchronous>, transform_indices = @transform_1, window_bounds = array<i64: 16, 128>}, {pipeline_mode = #tpu.pipeline_mode<synchronous>, transform_indices = @transform_2, window_bounds = array<i64: 5, 128, 128>}, {pipeline_mode = #tpu.pipeline_mode<synchronous>, transform_indices = @transform_3, window_bounds = array<i64: 16, 128>}, {pipeline_mode = #tpu.pipeline_mode<synchronous>, transform_indices = @transform_4, window_bounds = array<i64: 4, 128>}]} {
    %c0 = arith.constant 0 : index
    %c0_0 = arith.constant 0 : index
    %0 = vector.load %arg1[%c0, %c0_0] : memref<4x16xf32, #tpu.memory_space<vmem>>, vector<4x16xf32>
    %c0_1 = arith.constant 0 : index
    %c0_2 = arith.constant 0 : index
    %1 = vector.load %arg2[%c0_1, %c0_2] : memref<16x128xf32, #tpu.memory_space<vmem>>, vector<16x128xf32>
    %cst = arith.constant dense<0.000000e+00> : vector<4x128xf32>
    %2 = tpu.matmul %0, %1, %cst {dimension_numbers = #tpu.dot_dimension_numbers<[1], [0], [0], [1], [0, 0, 1, 1], [], []>} : vector<4x16xf32>, vector<16x128xf32>, vector<4x128xf32> -> vector<4x128xf32>
    %c0_3 = arith.constant 0 : index
    %c0_4 = arith.constant 0 : index
    %c0_5 = arith.constant 0 : index
    %3 = vector.load %arg3[%c0_3, %c0_4, %c0_5] : memref<5x128x128xf32, #tpu.memory_space<vmem>>, vector<1x128x128xf32>
    %4 = vector.shape_cast %3 : vector<1x128x128xf32> to vector<128x128xf32>
    %cst_6 = arith.constant dense<0.000000e+00> : vector<4x128xf32>
    %5 = tpu.matmul %2, %4, %cst_6 {dimension_numbers = #tpu.dot_dimension_numbers<[1], [0], [0], [1], [0, 0, 1, 1], [], []>} : vector<4x128xf32>, vector<128x128xf32>, vector<4x128xf32> -> vector<4x128xf32>
    %c0_7 = arith.constant 0 : index
    %c0_8 = arith.constant 0 : index
    %6 = vector.load %arg4[%c0_7, %c0_8] : memref<16x128xf32, #tpu.memory_space<vmem>>, vector<1x128xf32>
    %7 = vector.broadcast %6 : vector<1x128xf32> to vector<4x128xf32>
    %8 = arith.addf %5, %7 : vector<4x128xf32>
    %cst_9 = arith.constant dense<0.000000e+00> : vector<128xf32>
    %9 = vector.multi_reduction <add>, %8, %cst_9 [0] : vector<4x128xf32> to vector<128xf32>
    %10 = vector.shape_cast %9 : vector<128xf32> to vector<1x128xf32>
    %cst_10 = arith.constant 4.000000e+00 : f32
    %11 = vector.broadcast %cst_10 : f32 to vector<1x128xf32>
    %12 = arith.divf %10, %11 : vector<1x128xf32>
    %13 = arith.mulf %8, %8 : vector<4x128xf32>
    %cst_11 = arith.constant dense<0.000000e+00> : vector<128xf32>
    %14 = vector.multi_reduction <add>, %13, %cst_11 [0] : vector<4x128xf32> to vector<128xf32>
    %15 = vector.shape_cast %14 : vector<128xf32> to vector<1x128xf32>
    %cst_12 = arith.constant 4.000000e+00 : f32
    %16 = vector.broadcast %cst_12 : f32 to vector<1x128xf32>
    %17 = arith.divf %15, %16 : vector<1x128xf32>
    %18 = arith.mulf %12, %12 : vector<1x128xf32>
    %19 = arith.subf %17, %18 : vector<1x128xf32>
    %cst_13 = arith.constant 0.000000e+00 : f32
    %20 = vector.broadcast %cst_13 : f32 to vector<1x128xf32>
    %21 = arith.maximumf %19, %20 : vector<1x128xf32>
    %22 = vector.broadcast %12 : vector<1x128xf32> to vector<4x128xf32>
    %23 = arith.subf %8, %22 : vector<4x128xf32>
    %cst_14 = arith.constant 9.99999974E-6 : f32
    %24 = vector.broadcast %cst_14 : f32 to vector<1x128xf32>
    %25 = arith.addf %21, %24 : vector<1x128xf32>
    %26 = math.rsqrt %25 : vector<1x128xf32>
    %27 = vector.broadcast %26 : vector<1x128xf32> to vector<4x128xf32>
    %28 = arith.mulf %23, %27 : vector<4x128xf32>
    %c1 = arith.constant 1 : index
    %c0_15 = arith.constant 0 : index
    %29 = vector.load %arg4[%c1, %c0_15] : memref<16x128xf32, #tpu.memory_space<vmem>>, vector<1x128xf32>
    %30 = vector.broadcast %29 : vector<1x128xf32> to vector<4x128xf32>
    %31 = arith.mulf %28, %30 : vector<4x128xf32>
    %c2 = arith.constant 2 : index
    %c0_16 = arith.constant 0 : index
    %32 = vector.load %arg4[%c2, %c0_16] : memref<16x128xf32, #tpu.memory_space<vmem>>, vector<1x128xf32>
    %33 = vector.broadcast %32 : vector<1x128xf32> to vector<4x128xf32>
    %34 = arith.addf %31, %33 : vector<4x128xf32>
    %cst_17 = arith.constant 0.000000e+00 : f32
    %35 = vector.broadcast %cst_17 : f32 to vector<4x128xf32>
    %36 = arith.maximumf %34, %35 : vector<4x128xf32>
    %c1_18 = arith.constant 1 : index
    %c0_19 = arith.constant 0 : index
    %c0_20 = arith.constant 0 : index
    %37 = vector.load %arg3[%c1_18, %c0_19, %c0_20] : memref<5x128x128xf32, #tpu.memory_space<vmem>>, vector<1x128x128xf32>
    %38 = vector.shape_cast %37 : vector<1x128x128xf32> to vector<128x128xf32>
    %cst_21 = arith.constant dense<0.000000e+00> : vector<4x128xf32>
    %39 = tpu.matmul %36, %38, %cst_21 {dimension_numbers = #tpu.dot_dimension_numbers<[1], [0], [0], [1], [0, 0, 1, 1], [], []>} : vector<4x128xf32>, vector<128x128xf32>, vector<4x128xf32> -> vector<4x128xf32>
    %c3 = arith.constant 3 : index
    %c0_22 = arith.constant 0 : index
    %40 = vector.load %arg4[%c3, %c0_22] : memref<16x128xf32, #tpu.memory_space<vmem>>, vector<1x128xf32>
    %41 = vector.broadcast %40 : vector<1x128xf32> to vector<4x128xf32>
    %42 = arith.addf %39, %41 : vector<4x128xf32>
    %cst_23 = arith.constant dense<0.000000e+00> : vector<128xf32>
    %43 = vector.multi_reduction <add>, %42, %cst_23 [0] : vector<4x128xf32> to vector<128xf32>
    %44 = vector.shape_cast %43 : vector<128xf32> to vector<1x128xf32>
    %cst_24 = arith.constant 4.000000e+00 : f32
    %45 = vector.broadcast %cst_24 : f32 to vector<1x128xf32>
    %46 = arith.divf %44, %45 : vector<1x128xf32>
    %47 = arith.mulf %42, %42 : vector<4x128xf32>
    %cst_25 = arith.constant dense<0.000000e+00> : vector<128xf32>
    %48 = vector.multi_reduction <add>, %47, %cst_25 [0] : vector<4x128xf32> to vector<128xf32>
    %49 = vector.shape_cast %48 : vector<128xf32> to vector<1x128xf32>
    %cst_26 = arith.constant 4.000000e+00 : f32
    %50 = vector.broadcast %cst_26 : f32 to vector<1x128xf32>
    %51 = arith.divf %49, %50 : vector<1x128xf32>
    %52 = arith.mulf %46, %46 : vector<1x128xf32>
    %53 = arith.subf %51, %52 : vector<1x128xf32>
    %cst_27 = arith.constant 0.000000e+00 : f32
    %54 = vector.broadcast %cst_27 : f32 to vector<1x128xf32>
    %55 = arith.maximumf %53, %54 : vector<1x128xf32>
    %56 = vector.broadcast %46 : vector<1x128xf32> to vector<4x128xf32>
    %57 = arith.subf %42, %56 : vector<4x128xf32>
    %cst_28 = arith.constant 9.99999974E-6 : f32
    %58 = vector.broadcast %cst_28 : f32 to vector<1x128xf32>
    %59 = arith.addf %55, %58 : vector<1x128xf32>
    %60 = math.rsqrt %59 : vector<1x128xf32>
    %61 = vector.broadcast %60 : vector<1x128xf32> to vector<4x128xf32>
    %62 = arith.mulf %57, %61 : vector<4x128xf32>
    %c4 = arith.constant 4 : index
    %c0_29 = arith.constant 0 : index
    %63 = vector.load %arg4[%c4, %c0_29] : memref<16x128xf32, #tpu.memory_space<vmem>>, vector<1x128xf32>
    %64 = vector.broadcast %63 : vector<1x128xf32> to vector<4x128xf32>
    %65 = arith.mulf %62, %64 : vector<4x128xf32>
    %c5 = arith.constant 5 : index
    %c0_30 = arith.constant 0 : index
    %66 = vector.load %arg4[%c5, %c0_30] : memref<16x128xf32, #tpu.memory_space<vmem>>, vector<1x128xf32>
    %67 = vector.broadcast %66 : vector<1x128xf32> to vector<4x128xf32>
    %68 = arith.addf %65, %67 : vector<4x128xf32>
    %cst_31 = arith.constant 0.000000e+00 : f32
    %69 = vector.broadcast %cst_31 : f32 to vector<4x128xf32>
    %70 = arith.maximumf %68, %69 : vector<4x128xf32>
    %c2_32 = arith.constant 2 : index
    %c0_33 = arith.constant 0 : index
    %c0_34 = arith.constant 0 : index
    %71 = vector.load %arg3[%c2_32, %c0_33, %c0_34] : memref<5x128x128xf32, #tpu.memory_space<vmem>>, vector<1x128x128xf32>
    %72 = vector.shape_cast %71 : vector<1x128x128xf32> to vector<128x128xf32>
    %cst_35 = arith.constant dense<0.000000e+00> : vector<4x128xf32>
    %73 = tpu.matmul %70, %72, %cst_35 {dimension_numbers = #tpu.dot_dimension_numbers<[1], [0], [0], [1], [0, 0, 1, 1], [], []>} : vector<4x128xf32>, vector<128x128xf32>, vector<4x128xf32> -> vector<4x128xf32>
    %c6 = arith.constant 6 : index
    %c0_36 = arith.constant 0 : index
    %74 = vector.load %arg4[%c6, %c0_36] : memref<16x128xf32, #tpu.memory_space<vmem>>, vector<1x128xf32>
    %75 = vector.broadcast %74 : vector<1x128xf32> to vector<4x128xf32>
    %76 = arith.addf %73, %75 : vector<4x128xf32>
    %cst_37 = arith.constant dense<0.000000e+00> : vector<128xf32>
    %77 = vector.multi_reduction <add>, %76, %cst_37 [0] : vector<4x128xf32> to vector<128xf32>
    %78 = vector.shape_cast %77 : vector<128xf32> to vector<1x128xf32>
    %cst_38 = arith.constant 4.000000e+00 : f32
    %79 = vector.broadcast %cst_38 : f32 to vector<1x128xf32>
    %80 = arith.divf %78, %79 : vector<1x128xf32>
    %81 = arith.mulf %76, %76 : vector<4x128xf32>
    %cst_39 = arith.constant dense<0.000000e+00> : vector<128xf32>
    %82 = vector.multi_reduction <add>, %81, %cst_39 [0] : vector<4x128xf32> to vector<128xf32>
    %83 = vector.shape_cast %82 : vector<128xf32> to vector<1x128xf32>
    %cst_40 = arith.constant 4.000000e+00 : f32
    %84 = vector.broadcast %cst_40 : f32 to vector<1x128xf32>
    %85 = arith.divf %83, %84 : vector<1x128xf32>
    %86 = arith.mulf %80, %80 : vector<1x128xf32>
    %87 = arith.subf %85, %86 : vector<1x128xf32>
    %cst_41 = arith.constant 0.000000e+00 : f32
    %88 = vector.broadcast %cst_41 : f32 to vector<1x128xf32>
    %89 = arith.maximumf %87, %88 : vector<1x128xf32>
    %90 = vector.broadcast %80 : vector<1x128xf32> to vector<4x128xf32>
    %91 = arith.subf %76, %90 : vector<4x128xf32>
    %cst_42 = arith.constant 9.99999974E-6 : f32
    %92 = vector.broadcast %cst_42 : f32 to vector<1x128xf32>
    %93 = arith.addf %89, %92 : vector<1x128xf32>
    %94 = math.rsqrt %93 : vector<1x128xf32>
    %95 = vector.broadcast %94 : vector<1x128xf32> to vector<4x128xf32>
    %96 = arith.mulf %91, %95 : vector<4x128xf32>
    %c7 = arith.constant 7 : index
    %c0_43 = arith.constant 0 : index
    %97 = vector.load %arg4[%c7, %c0_43] : memref<16x128xf32, #tpu.memory_space<vmem>>, vector<1x128xf32>
    %98 = vector.broadcast %97 : vector<1x128xf32> to vector<4x128xf32>
    %99 = arith.mulf %96, %98 : vector<4x128xf32>
    %c8 = arith.constant 8 : index
    %c0_44 = arith.constant 0 : index
    %100 = vector.load %arg4[%c8, %c0_44] : memref<16x128xf32, #tpu.memory_space<vmem>>, vector<1x128xf32>
    %101 = vector.broadcast %100 : vector<1x128xf32> to vector<4x128xf32>
    %102 = arith.addf %99, %101 : vector<4x128xf32>
    %cst_45 = arith.constant 0.000000e+00 : f32
    %103 = vector.broadcast %cst_45 : f32 to vector<4x128xf32>
    %104 = arith.maximumf %102, %103 : vector<4x128xf32>
    %c3_46 = arith.constant 3 : index
    %c0_47 = arith.constant 0 : index
    %c0_48 = arith.constant 0 : index
    %105 = vector.load %arg3[%c3_46, %c0_47, %c0_48] : memref<5x128x128xf32, #tpu.memory_space<vmem>>, vector<1x128x128xf32>
    %106 = vector.shape_cast %105 : vector<1x128x128xf32> to vector<128x128xf32>
    %cst_49 = arith.constant dense<0.000000e+00> : vector<4x128xf32>
    %107 = tpu.matmul %104, %106, %cst_49 {dimension_numbers = #tpu.dot_dimension_numbers<[1], [0], [0], [1], [0, 0, 1, 1], [], []>} : vector<4x128xf32>, vector<128x128xf32>, vector<4x128xf32> -> vector<4x128xf32>
    %c9 = arith.constant 9 : index
    %c0_50 = arith.constant 0 : index
    %108 = vector.load %arg4[%c9, %c0_50] : memref<16x128xf32, #tpu.memory_space<vmem>>, vector<1x128xf32>
    %109 = vector.broadcast %108 : vector<1x128xf32> to vector<4x128xf32>
    %110 = arith.addf %107, %109 : vector<4x128xf32>
    %cst_51 = arith.constant dense<0.000000e+00> : vector<128xf32>
    %111 = vector.multi_reduction <add>, %110, %cst_51 [0] : vector<4x128xf32> to vector<128xf32>
    %112 = vector.shape_cast %111 : vector<128xf32> to vector<1x128xf32>
    %cst_52 = arith.constant 4.000000e+00 : f32
    %113 = vector.broadcast %cst_52 : f32 to vector<1x128xf32>
    %114 = arith.divf %112, %113 : vector<1x128xf32>
    %115 = arith.mulf %110, %110 : vector<4x128xf32>
    %cst_53 = arith.constant dense<0.000000e+00> : vector<128xf32>
    %116 = vector.multi_reduction <add>, %115, %cst_53 [0] : vector<4x128xf32> to vector<128xf32>
    %117 = vector.shape_cast %116 : vector<128xf32> to vector<1x128xf32>
    %cst_54 = arith.constant 4.000000e+00 : f32
    %118 = vector.broadcast %cst_54 : f32 to vector<1x128xf32>
    %119 = arith.divf %117, %118 : vector<1x128xf32>
    %120 = arith.mulf %114, %114 : vector<1x128xf32>
    %121 = arith.subf %119, %120 : vector<1x128xf32>
    %cst_55 = arith.constant 0.000000e+00 : f32
    %122 = vector.broadcast %cst_55 : f32 to vector<1x128xf32>
    %123 = arith.maximumf %121, %122 : vector<1x128xf32>
    %124 = vector.broadcast %114 : vector<1x128xf32> to vector<4x128xf32>
    %125 = arith.subf %110, %124 : vector<4x128xf32>
    %cst_56 = arith.constant 9.99999974E-6 : f32
    %126 = vector.broadcast %cst_56 : f32 to vector<1x128xf32>
    %127 = arith.addf %123, %126 : vector<1x128xf32>
    %128 = math.rsqrt %127 : vector<1x128xf32>
    %129 = vector.broadcast %128 : vector<1x128xf32> to vector<4x128xf32>
    %130 = arith.mulf %125, %129 : vector<4x128xf32>
    %c10 = arith.constant 10 : index
    %c0_57 = arith.constant 0 : index
    %131 = vector.load %arg4[%c10, %c0_57] : memref<16x128xf32, #tpu.memory_space<vmem>>, vector<1x128xf32>
    %132 = vector.broadcast %131 : vector<1x128xf32> to vector<4x128xf32>
    %133 = arith.mulf %130, %132 : vector<4x128xf32>
    %c11 = arith.constant 11 : index
    %c0_58 = arith.constant 0 : index
    %134 = vector.load %arg4[%c11, %c0_58] : memref<16x128xf32, #tpu.memory_space<vmem>>, vector<1x128xf32>
    %135 = vector.broadcast %134 : vector<1x128xf32> to vector<4x128xf32>
    %136 = arith.addf %133, %135 : vector<4x128xf32>
    %137 = arith.addf %136, %70 : vector<4x128xf32>
    %cst_59 = arith.constant 0.000000e+00 : f32
    %138 = vector.broadcast %cst_59 : f32 to vector<4x128xf32>
    %139 = arith.maximumf %137, %138 : vector<4x128xf32>
    %c4_60 = arith.constant 4 : index
    %c0_61 = arith.constant 0 : index
    %c0_62 = arith.constant 0 : index
    %140 = vector.load %arg3[%c4_60, %c0_61, %c0_62] : memref<5x128x128xf32, #tpu.memory_space<vmem>>, vector<1x128x128xf32>
    %141 = vector.shape_cast %140 : vector<1x128x128xf32> to vector<128x128xf32>
    %cst_63 = arith.constant dense<0.000000e+00> : vector<4x128xf32>
    %142 = tpu.matmul %139, %141, %cst_63 {dimension_numbers = #tpu.dot_dimension_numbers<[1], [0], [0], [1], [0, 0, 1, 1], [], []>} : vector<4x128xf32>, vector<128x128xf32>, vector<4x128xf32> -> vector<4x128xf32>
    %c12 = arith.constant 12 : index
    %c0_64 = arith.constant 0 : index
    %143 = vector.load %arg4[%c12, %c0_64] : memref<16x128xf32, #tpu.memory_space<vmem>>, vector<1x128xf32>
    %144 = vector.broadcast %143 : vector<1x128xf32> to vector<4x128xf32>
    %145 = arith.addf %142, %144 : vector<4x128xf32>
    %c0_65 = arith.constant 0 : index
    %c0_66 = arith.constant 0 : index
    %146 = vector.load %arg5[%c0_65, %c0_66] : memref<4x128xf32, #tpu.memory_space<vmem>>, vector<4x128xf32>
    tpu.vector_store %arg5[%c0_65, %c0_66], %145 {strides = array<i32>} : memref<4x128xf32, #tpu.memory_space<vmem>>, vector<4x128xf32>,
    return
  }
  func.func @transform_0(%arg0: i32) -> (i32, i32) {
    %c0_i32 = arith.constant 0 : i32
    %c0_i32_0 = arith.constant 0 : i32
    %c0_i32_1 = arith.constant 0 : i32
    return %c0_i32, %c0_i32_0 : i32, i32
  }
  func.func @transform_1(%arg0: i32) -> (i32, i32) {
    %c0_i32 = arith.constant 0 : i32
    %c0_i32_0 = arith.constant 0 : i32
    %c0_i32_1 = arith.constant 0 : i32
    return %c0_i32, %c0_i32_0 : i32, i32
  }
  func.func @transform_2(%arg0: i32) -> (i32, i32, i32) {
    %c0_i32 = arith.constant 0 : i32
    %c0_i32_0 = arith.constant 0 : i32
    %c0_i32_1 = arith.constant 0 : i32
    %c0_i32_2 = arith.constant 0 : i32
    return %c0_i32, %c0_i32_0, %c0_i32_1 : i32, i32, i32
  }
  func.func @transform_3(%arg0: i32) -> (i32, i32) {
    %c0_i32 = arith.constant 0 : i32
    %c0_i32_0 = arith.constant 0 : i32
    %c0_i32_1 = arith.constant 0 : i32
    return %c0_i32, %c0_i32_0 : i32, i32
  }
  func.func @transform_4(%arg0: i32) -> (i32, i32) {
    %c0_i32 = arith.constant 0 : i32
    %c0_i32_0 = arith.constant 0 : i32
    %c0_i32_1 = arith.constant 0 : i32
    return %c0_i32, %c0_i32_0 : i32, i32
  }
}

</mosaic_0001>

<bundles_post_ra>
// kernel: tpu_custom_call.1
= control target key start
LH: loop header
LB: loop body
LE: loop exit
PB: predicated region body
PF: predicated region fallthrough
CT: control target
= control target key end

     0   :  { %9 = vsyncpa [#allocation3], 0  ;;  %s1491_s0 = inlined_call_operand.hbm [shape: f32[4,16], index: 0, kind: input, shape index: {}]   ;;  %s1492_s1 = inlined_call_operand.hbm [shape: f32[16,128], index: 1, kind: input, shape index: {}]   ;;  %s1493_s2 = inlined_call_operand.hbm [shape: f32[5,128,128], index: 2, kind: input, shape index: {}]   ;;  %s1494_s3 = inlined_call_operand.hbm [shape: f32[16,128], index: 3, kind: input, shape index: {}]   ;;  %s1495_s4 = inlined_call_operand.hbm [shape: f32[4,128], index: 4, kind: output, shape index: {}]  }
   0x1   :  { %10 = vsyncpa [#allocation6], 0 }
   0x2   :  { %11 = vsyncpa [#allocation9], 0 }
   0x3   :  { %12 = vsyncpa [#allocation4], 0  ;;  %s1319_s15 = smov [#allocation5]   ;;  %s1201_s19 = scalar_lea.hbm %s1492_s1, 256 }
   0x4   :  { %s28_s16 = sshll.u32 %s1319_s15, 4  ;;  %p1202_p0 = scmp.ne.s32.totalorder %s1492_s1, %s1201_s19  ;;  %s29_s16 = int_to_ptr.vmem [resolvable:$true] %s28_s16 }
   0x5   :  { %p1205_p1 = scmp.lt.u32.totalorder %s1201_s19, %s1492_s1 }
   0x7   :  { %p1207_p2 = pnand %p1205_p1, %p1202_p0 }
   0x9   :  { %1210 = shalt.err (!%p1207_p2)
}
   0xa   :  { %s1211_s24 = scalar_lea.vmem %s29_s16, 256  ;;  %p1216_p4 = scmp.lt.s32.totalorder %s29_s16, %s29_s16 }
   0xb   :  { %p1212_p3 = scmp.ne.s32.totalorder %s29_s16, %s1211_s24  ;;  %p1217_p5 = scmp.lt.s32.totalorder %s1211_s24, %s1211_s24 }
   0xd   :  { %p1218_p6 = por %p1217_p5, %p1216_p4 }
   0xf   :  { %p1219_p7 = pnand %p1218_p6, %p1212_p3 }
  0x11   :  { %1222 = shalt.err (!%p1219_p7)
}
  0x12   :  { %s1320_s25 = smov 128   ;;  %s1321_s26 = smov 8  }
  0x13   :  { %34 = dma.hbm_to_vmem [thread:$0]  %s1492_s1, 256, %s29_s16, [#allocation6], %s1320_s25, %s1320_s25, %s1321_s26  }
  0x14   :  { %s1322_s29 = smov [#allocation2]   ;;  %s1323_s5 = smov [#allocation7]  }
  0x15   :  { %s19_s30 = sshll.u32 %s1322_s29, 4  ;;  %s40_s6 = sshll.u32 %s1323_s5, 4  ;;  %s20_s30 = int_to_ptr.vmem [resolvable:$true] %s19_s30  ;;  %s41_s6 = int_to_ptr.vmem [resolvable:$true] %s40_s6 }
  0x16   :  { %s1223_s9 = scalar_lea.hbm %s1491_s0, 64 }
  0x17   :  { %p1224_p8 = scmp.ne.s32.totalorder %s1491_s0, %s1223_s9  ;;  %p1227_p9 = scmp.lt.u32.totalorder %s1223_s9, %s1491_s0 }
  0x19   :  { %p1229_p10 = pnand %p1227_p9, %p1224_p8 }
  0x1b   :  { %1232 = shalt.err (!%p1229_p10)
}
  0x1c   :  { %s1233_s1 = scalar_lea.vmem %s20_s30, 64  ;;  %p1238_p12 = scmp.lt.s32.totalorder %s20_s30, %s20_s30 }
  0x1d   :  { %p1234_p11 = scmp.ne.s32.totalorder %s20_s30, %s1233_s1  ;;  %p1239_p13 = scmp.lt.s32.totalorder %s1233_s1, %s1233_s1 }
  0x1f   :  { %p1240_p0 = por %p1239_p13, %p1238_p12 }
  0x21   :  { %p1241_p1 = pnand %p1240_p0, %p1234_p11 }
  0x23   :  { %1244 = shalt.err (!%p1241_p1)
}
  0x24   :  { %22 = dma.hbm_to_vmem [thread:$0]  %s1491_s0, 64, %s20_s30, [#allocation3]  }
  0x25   :  { %s1245_s18 = scalar_lea.hbm %s1493_s2, 10240 }
  0x26   :  { %p1246_p2 = scmp.ne.s32.totalorder %s1493_s2, %s1245_s18  ;;  %p1249_p3 = scmp.lt.u32.totalorder %s1245_s18, %s1493_s2 }
  0x28   :  { %p1251_p4 = pnand %p1249_p3, %p1246_p2 }
  0x2a   :  { %1254 = shalt.err (!%p1251_p4)
}
  0x2b   :  { %s1255_s23 = scalar_lea.vmem %s41_s6, 10240  ;;  %p1260_p6 = scmp.lt.s32.totalorder %s41_s6, %s41_s6 }
  0x2c   :  { %p1256_p5 = scmp.ne.s32.totalorder %s41_s6, %s1255_s23  ;;  %p1261_p7 = scmp.lt.s32.totalorder %s1255_s23, %s1255_s23 }
  0x2e   :  { %p1262_p8 = por %p1261_p7, %p1260_p6 }
  0x30   :  { %p1263_p9 = pnand %p1262_p8, %p1256_p5 }
  0x32   :  { %1266 = shalt.err (!%p1263_p9)
}
  0x33   :  { %46 = dma.hbm_to_vmem [thread:$0]  %s1493_s2, 10240, %s41_s6, [#allocation6], %s1320_s25, %s1320_s25, %s1321_s26  }
  0x34   :  { %s1324_s27 = smov [#allocation8]   ;;  %s1267_s5 = scalar_lea.hbm %s1494_s3, 256 }
  0x35   :  { %s52_s28 = sshll.u32 %s1324_s27, 4  ;;  %p1268_p10 = scmp.ne.s32.totalorder %s1494_s3, %s1267_s5  ;;  %s53_s28 = int_to_ptr.vmem [resolvable:$true] %s52_s28 }
  0x36   :  { %p1271_p11 = scmp.lt.u32.totalorder %s1267_s5, %s1494_s3 }
  0x38   :  { %p1273_p12 = pnand %p1271_p11, %p1268_p10 }
  0x3a   :  { %1276 = shalt.err (!%p1273_p12)
}
  0x3b   :  { %s1277_s11 = scalar_lea.vmem %s53_s28, 256  ;;  %p1282_p0 = scmp.lt.s32.totalorder %s53_s28, %s53_s28 }
  0x3c   :  { %p1278_p13 = scmp.ne.s32.totalorder %s53_s28, %s1277_s11  ;;  %p1283_p1 = scmp.lt.s32.totalorder %s1277_s11, %s1277_s11 }
  0x3e   :  { %p1284_p2 = por %p1283_p1, %p1282_p0 }
  0x40   :  { %p1285_p3 = pnand %p1284_p2, %p1278_p13 }
  0x42   :  { %1288 = shalt.err (!%p1285_p3)
}
  0x43   :  { %58 = dma.hbm_to_vmem [thread:$0]  %s1494_s3, 256, %s53_s28, [#allocation9], %s1320_s25, %s1320_s25, %s1321_s26  }
  0x44   :  { %1311 = dma.done.wait [#allocation3], 64  }
  0x45   :  { %1312 = vsyncadd [#allocation3], 4294967232 }
  0x46   :  { %1313 = dma.done.wait [#allocation6], 10496  }
  0x47   :  { %1314 = vsyncadd [#allocation6], 4294956800 }
  0x48   :  { %1315 = dma.done.wait [#allocation9], 256  }
  0x49   :  { %1316 = vsyncadd [#allocation9], 4294967040  ;;  %v1325_v0 = vmov 0.0|0.0   ;;  %vm1326_vm0 = vmmov 0   ;;  %v1327_v1 = vmov 0.0   ;;  %v72_v2 = vld [vmem:[#allocation5] sm:$0xff] }
  0x4a   :  { %1060 = vmatprep.subr.bf16.mxu0 %v1325_v0  ;;  %882 = vmatprep.mubr.msk.f32.mxu0 %vm1326_vm0, %v1327_v1  ;;  %v73_v3 = vld [vmem:[#allocation5 + $0x8] sm:$0xff]  ;;  %v148_v5 = vld [vmem:[#allocation7] sm:$0xff]  ;;  %v149_v6 = vld [vmem:[#allocation7 + $0x8] sm:$0xff]  ;;  %vm74_vm1 = vcmask 130048   ;;  %vm239_vm2 = vcmask 1043456   ;;  %s1328_s3 = smov [#allocation10]  }
  0x4b   :  { %1063 = vmatprep.subr.bf16.mxu1 %v1325_v0  ;;  %917 = vmatprep.mubr.msk.f32.mxu1 %vm1326_vm0, %v1327_v1  ;;  %v1061_v4 = vpack.c.bf16 %v73_v3, %v72_v2  ;;  %v150_v7 = vld [vmem:[#allocation7 + $0x10] sm:$0xff]  ;;  %v1064_v8 = vpack.c.bf16 %v149_v6, %v148_v5  ;;  %v151_v9 = vld [vmem:[#allocation7 + $0x18] sm:$0xff]  ;;  %v71_v10 = vld [vmem:[#allocation2] sm:$0xf]  ;;  %s765_s25 = sshll.u32 %s1328_s3, 4  ;;  %s766_s25 = int_to_ptr.vmem [resolvable:$true] %s765_s25 }
  0x4c   :  { %v1067_v11 = vpack.c.bf16 %v151_v9, %v150_v7  ;;  %v152_v12 = vld [vmem:[#allocation7 + $0x20] sm:$0xff]  ;;  %v153_v13 = vld [vmem:[#allocation7 + $0x28] sm:$0xff]  ;;  %v154_v15 = vld [vmem:[#allocation7 + $0x30] sm:$0xff]  ;;  %s1289_s26 = scalar_lea.vmem %s766_s25, 64  ;;  %p1294_p5 = scmp.lt.s32.totalorder %s766_s25, %s766_s25 }
  0x4d   :  { %1062 = vmatpush3.bf16.msra.mxu0 %v1061_v4  ;;  %1065 = vmatpush3.bf16.msra.mxu1 %v1064_v8  ;;  %v1070_v14 = vpack.c.bf16 %v153_v13, %v152_v12  ;;  %v155_v16 = vld [vmem:[#allocation7 + $0x38] sm:$0xff]  ;;  %v156_v18 = vld [vmem:[#allocation7 + $0x40] sm:$0xff]  ;;  %v157_v19 = vld [vmem:[#allocation7 + $0x48] sm:$0xff]  ;;  %p1290_p4 = scmp.ne.s32.totalorder %s766_s25, %s1289_s26  ;;  %p1295_p6 = scmp.lt.s32.totalorder %s1289_s26, %s1289_s26 }
  0x4e   :  { %1087 = vmatprep.subr.bf16.mxu0 %v1325_v0  ;;  %1066 = vmatprep.subr.bf16.mxu1 %v1325_v0  ;;  %v1073_v17 = vpack.c.bf16 %v155_v16, %v154_v15  ;;  %v1076_v20 = vpack.c.bf16 %v157_v19, %v156_v18  ;;  %v158_v21 = vld [vmem:[#allocation7 + $0x50] sm:$0xff]  ;;  %v159_v22 = vld [vmem:[#allocation7 + $0x58] sm:$0xff]  ;;  %v160_v24 = vld [vmem:[#allocation7 + $0x60] sm:$0xff] }
  0x4f   :  { %v1079_v23 = vpack.c.bf16 %v159_v22, %v158_v21  ;;  %v161_v25 = vld [vmem:[#allocation7 + $0x68] sm:$0xff]  ;;  %v162_v27 = vld [vmem:[#allocation7 + $0x70] sm:$0xff]  ;;  %v163_v28 = vld [vmem:[#allocation7 + $0x78] sm:$0xff]  ;;  %p1296_p7 = por %p1295_p6, %p1294_p5 }
  0x50   :  { %883 = vmatmul.mubr.msk.f32.vlgmr.msra.gmra.mrb[0].mxu0 %vm74_vm1, %v71_v10  ;;  %v1082_v26 = vpack.c.bf16 %v161_v25, %v160_v24  ;;  %v1085_v29 = vpack.c.bf16 %v163_v28, %v162_v27  ;;  %v279_v32 = vld [vmem:[#allocation7 + $0x80] sm:$0xff]  ;;  %v280_v33 = vld [vmem:[#allocation7 + $0x88] sm:$0xff]  ;;  %v281_v35 = vld [vmem:[#allocation7 + $0x90] sm:$0xff] }
  0x51   :  { %952 = vmatprep.mubr.msk.f32.mxu0 %vm1326_vm0, %v1327_v1  ;;  %1068 = vmatpush3.bf16.msra.mxu1 %v1067_v11  ;;  %v1088_v34 = vpack.c.bf16 %v280_v33, %v279_v32  ;;  %v282_v36 = vld [vmem:[#allocation7 + $0x98] sm:$0xff]  ;;  %v283_v38 = vld [vmem:[#allocation7 + $0xa0] sm:$0xff]  ;;  %v284_v39 = vld [vmem:[#allocation7 + $0xa8] sm:$0xff]  ;;  %p1297_p8 = pnand %p1296_p7, %p1290_p4 }
  0x52   :  { %1069 = vmatprep.subr.bf16.mxu1 %v1325_v0  ;;  %v1091_v37 = vpack.c.bf16 %v282_v36, %v281_v35  ;;  %v1094_v40 = vpack.c.bf16 %v284_v39, %v283_v38  ;;  %v285_v41 = vld [vmem:[#allocation7 + $0xb0] sm:$0xff]  ;;  %v286_v42 = vld [vmem:[#allocation7 + $0xb8] sm:$0xff]  ;;  %v287_v44 = vld [vmem:[#allocation7 + $0xc0] sm:$0xff] }
  0x53   :  { %1089 = vmatpush3.bf16.msra.mxu0 %v1088_v34  ;;  %v1097_v43 = vpack.c.bf16 %v286_v42, %v285_v41  ;;  %v288_v45 = vld [vmem:[#allocation7 + $0xc8] sm:$0xff]  ;;  %v289_v47 = vld [vmem:[#allocation7 + $0xd0] sm:$0xff]  ;;  %v290_v48 = vld [vmem:[#allocation7 + $0xd8] sm:$0xff] }
  0x54   :  { %1090 = vmatprep.subr.bf16.mxu0 %v1325_v0  ;;  %v1100_v46 = vpack.c.bf16 %v288_v45, %v287_v44  ;;  %v1103_v49 = vpack.c.bf16 %v290_v48, %v289_v47  ;;  %v291_v50 = vld [vmem:[#allocation7 + $0xe0] sm:$0xff]  ;;  %v292_v51 = vld [vmem:[#allocation7 + $0xe8] sm:$0xff]  ;;  %v293_v53 = vld [vmem:[#allocation7 + $0xf0] sm:$0xff] }
  0x55   :  { %1071 = vmatpush3.bf16.msra.mxu1 %v1070_v14  ;;  %v1106_v52 = vpack.c.bf16 %v292_v51, %v291_v50  ;;  %v294_v54 = vld [vmem:[#allocation7 + $0xf8] sm:$0xff]  ;;  %v777_v56 = vld [vmem:[#allocation8] ss:$0 sm:$0xff]  ;;  %v778_v21 = vld [vmem:[#allocation8 + $0x1] ss:$0 sm:$0xff] }
  0x56   :  { %1072 = vmatprep.subr.bf16.mxu1 %v1325_v0  ;;  %v1109_v55 = vpack.c.bf16 %v294_v54, %v293_v53  ;;  %v408_v27 = vld [vmem:[#allocation7 + $0x100] sm:$0xff]  ;;  %v409_v28 = vld [vmem:[#allocation7 + $0x108] sm:$0xff]  ;;  %v414_v36 = vld [vmem:[#allocation7 + $0x130] sm:$0xff] }
  0x57   :  { %1092 = vmatpush3.bf16.msra.mxu0 %v1091_v37  ;;  %v412_v33 = vld [vmem:[#allocation7 + $0x120] sm:$0xff]  ;;  %v413_v34 = vld [vmem:[#allocation7 + $0x128] sm:$0xff]  ;;  %v415_v37 = vld [vmem:[#allocation7 + $0x138] sm:$0xff] }
  0x58   :  { %1093 = vmatprep.subr.bf16.mxu0 %v1325_v0  ;;  %v1118_v35 = vpack.c.bf16 %v413_v34, %v412_v33  ;;  %v1121_v38 = vpack.c.bf16 %v415_v37, %v414_v36  ;;  %v416_v39 = vld [vmem:[#allocation7 + $0x140] sm:$0xff]  ;;  %v418_v42 = vld [vmem:[#allocation7 + $0x150] sm:$0xff]  ;;  %v546_v34 = vld [vmem:[#allocation7 + $0x1c8] sm:$0xff] }
  0x59   :  { %1074 = vmatpush3.bf16.msra.mxu1 %v1073_v17  ;;  %v420_v45 = vld [vmem:[#allocation7 + $0x160] sm:$0xff]  ;;  %v422_v48 = vld [vmem:[#allocation7 + $0x170] sm:$0xff]  ;;  %v548_v37 = vld [vmem:[#allocation7 + $0x1d8] sm:$0xff] }
  0x5a   :  { %1075 = vmatprep.subr.bf16.mxu1 %v1325_v0  ;;  %v780_v51 = vld [vmem:[#allocation8 + $0x3] ss:$0 sm:$0xff]  ;;  %v547_v36 = vld [vmem:[#allocation7 + $0x1d0] sm:$0xff] }
  0x5b   :  { %1095 = vmatpush3.bf16.msra.mxu0 %v1094_v40  ;;  %v417_v40 = vld [vmem:[#allocation7 + $0x148] sm:$0xff]  ;;  %v545_v33 = vld [vmem:[#allocation7 + $0x1c0] sm:$0xff] }
  0x5c   :  { %1096 = vmatprep.subr.bf16.mxu0 %v1325_v0  ;;  %v1124_v41 = vpack.c.bf16 %v417_v40, %v416_v39  ;;  %v549_v39 = vld [vmem:[#allocation7 + $0x1e0] sm:$0xff]  ;;  %v550_v40 = vld [vmem:[#allocation7 + $0x1e8] sm:$0xff] }
  0x5d   :  { %1077 = vmatpush3.bf16.msra.mxu1 %v1076_v20 }
  0x5e   :  { %1078 = vmatprep.subr.bf16.mxu1 %v1325_v0 }
  0x5f   :  { %1098 = vmatpush3.bf16.msra.mxu0 %v1097_v43  ;;  %v419_v43 = vld [vmem:[#allocation7 + $0x158] sm:$0xff] }
  0x60   :  { %1099 = vmatprep.subr.bf16.mxu0 %v1325_v0  ;;  %v1127_v44 = vpack.c.bf16 %v419_v43, %v418_v42  ;;  %v551_v42 = vld [vmem:[#allocation7 + $0x1f0] sm:$0xff]  ;;  %v552_v43 = vld [vmem:[#allocation7 + $0x1f8] sm:$0xff] }
  0x61   :  { %1080 = vmatpush3.bf16.msra.mxu1 %v1079_v23  ;;  %v779_v23 = vld [vmem:[#allocation8 + $0x2] ss:$0 sm:$0xff] }
  0x62   :  { %1081 = vmatprep.subr.bf16.mxu1 %v1325_v0 }
  0x63   :  { %1101 = vmatpush3.bf16.msra.mxu0 %v1100_v46  ;;  %v421_v46 = vld [vmem:[#allocation7 + $0x168] sm:$0xff] }
  0x64   :  { %1102 = vmatprep.subr.bf16.mxu0 %v1325_v0  ;;  %v1130_v47 = vpack.c.bf16 %v421_v46, %v420_v45  ;;  %v783_v45 = vld [vmem:[#allocation8 + $0x6] ss:$0 sm:$0xff] }
  0x65   :  { %1083 = vmatpush3.bf16.msra.mxu1 %v1082_v26 }
  0x66   :  { %1084 = vmatprep.subr.bf16.mxu1 %v1325_v0 }
  0x67   :  { %1104 = vmatpush3.bf16.msra.mxu0 %v1103_v49  ;;  %v423_v49 = vld [vmem:[#allocation7 + $0x178] sm:$0xff] }
  0x68   :  { %1105 = vmatprep.subr.bf16.mxu0 %v1325_v0  ;;  %v1133_v50 = vpack.c.bf16 %v423_v49, %v422_v48 }
  0x69   :  { %1086 = vmatpush3.bf16.msra.mxu1 %v1085_v29  ;;  %v1112_v29 = vpack.c.bf16 %v409_v28, %v408_v27  ;;  %v541_v28 = vld [vmem:[#allocation7 + $0x1a0] sm:$0xff] }
  0x6a   :  { %1111 = vmatprep.subr.bf16.mxu1 %v1325_v0 }
  0x6b   :  { %1107 = vmatpush3.bf16.msra.mxu0 %v1106_v52 }
  0x6c   :  { %1108 = vmatprep.subr.bf16.mxu0 %v1325_v0 }
  0x6f   :  { %1110 = vmatpush3.bf16.msra.mxu0 %v1109_v55 }
  0x70   :  { %1135 = vmatprep.subr.bf16.mxu0 %v1325_v0 }
 0x123   :  { %v144_v30 = vpop.f32.mrb[0].mxu0 }
 0x124   :  { %v884_v31 = vpop.f32.mrb[1].mxu0  ;;  %918 = vmatmul.mubr.f32.vlgmr.msra.gmra.mrb[0].mxu1 %v144_v30  ;;  %v410_v30 = vld [vmem:[#allocation7 + $0x110] sm:$0xff] }
 0x125   :  { %987 = vmatprep.mubr.msk.f32.mxu1 %vm1326_vm0, %v1327_v1  ;;  %1113 = vmatpush3.bf16.msra.mxu1 %v1112_v29  ;;  %v411_v31 = vld [vmem:[#allocation7 + $0x118] sm:$0xff]  ;;  %v542_v29 = vld [vmem:[#allocation7 + $0x1a8] sm:$0xff] }
 0x126   :  { %1114 = vmatprep.subr.bf16.mxu1 %v1325_v0  ;;  %v1115_v32 = vpack.c.bf16 %v411_v31, %v410_v30  ;;  %v1142_v30 = vpack.c.bf16 %v542_v29, %v541_v28  ;;  %v543_v31 = vld [vmem:[#allocation7 + $0x1b0] sm:$0xff]  ;;  %v674_v28 = vld [vmem:[#allocation7 + $0x238] sm:$0xff] }
 0x129   :  { %1116 = vmatpush3.bf16.msra.mxu1 %v1115_v32 }
 0x12a   :  { %1117 = vmatprep.subr.bf16.mxu1 %v1325_v0 }
 0x12d   :  { %1119 = vmatpush3.bf16.msra.mxu1 %v1118_v35  ;;  %v1148_v35 = vpack.c.bf16 %v546_v34, %v545_v33  ;;  %v678_v33 = vld [vmem:[#allocation7 + $0x258] sm:$0xff] }
 0x12e   :  { %1120 = vmatprep.subr.bf16.mxu1 %v1325_v0 }
 0x131   :  { %1122 = vmatpush3.bf16.msra.mxu1 %v1121_v38  ;;  %v1151_v38 = vpack.c.bf16 %v548_v37, %v547_v36  ;;  %v680_v36 = vld [vmem:[#allocation7 + $0x268] sm:$0xff] }
 0x132   :  { %1123 = vmatprep.subr.bf16.mxu1 %v1325_v0 }
 0x135   :  { %1125 = vmatpush3.bf16.msra.mxu1 %v1124_v41  ;;  %v1154_v41 = vpack.c.bf16 %v550_v40, %v549_v39  ;;  %v682_v39 = vld [vmem:[#allocation7 + $0x278] sm:$0xff] }
 0x136   :  { %1126 = vmatprep.subr.bf16.mxu1 %v1325_v0 }
 0x139   :  { %1128 = vmatpush3.bf16.msra.mxu1 %v1127_v44  ;;  %v1157_v44 = vpack.c.bf16 %v552_v43, %v551_v42 }
 0x13a   :  { %1129 = vmatprep.subr.bf16.mxu1 %v1325_v0 }
 0x13d   :  { %1131 = vmatpush3.bf16.msra.mxu1 %v1130_v47 }
 0x13e   :  { %1132 = vmatprep.subr.bf16.mxu1 %v1325_v0 }
 0x141   :  { %1134 = vmatpush3.bf16.msra.mxu1 %v1133_v50 }
 0x142   :  { %1159 = vmatprep.subr.bf16.mxu1 %v1325_v0 }
 0x1f7   :  { %v235_v57 = vpop.f32.mrb[0].mxu1 }
 0x1f8   :  { %v236_v58 = vadd.f32 %v777_v56, %v235_v57  ;;  %v919_v59 = vpop.f32.mrb[1].mxu1 }
 0x1fa   :  { %v240_v60 = vsel %vm239_vm2, %v236_v58, 0.0  ;;  %v249_v61 = vmul.f32 %v236_v58, %v236_v58 }
 0x1fb   :  { %v241_v62 = vrot.slane %v240_v60, 4 }
 0x1fc   :  { %v250_v63 = vsel %vm239_vm2, %v249_v61, 0.0 }
 0x1fd   :  { %v242_v2 = vadd.f32 %v241_v62, %v240_v60  ;;  %v251_v3 = vrot.slane %v250_v63, 4 }
 0x1ff   :  { %v243_v4 = vrot.slane %v242_v2, 2  ;;  %v252_v5 = vadd.f32 %v251_v3, %v250_v63 }
 0x201   :  { %v244_v6 = vadd.f32 %v243_v4, %v242_v2  ;;  %v253_v7 = vrot.slane %v252_v5, 2 }
 0x203   :  { %v245_v8 = vrot.slane %v244_v6, 1  ;;  %v254_v9 = vadd.f32 %v253_v7, %v252_v5 }
 0x205   :  { %v246_v10 = vadd.f32 %v245_v8, %v244_v6  ;;  %v255_v11 = vrot.slane %v254_v9, 1 }
 0x207   :  { %v248_v12 = vmul.f32 0.25, %v246_v10  ;;  %v256_v13 = vadd.f32 %v255_v11, %v254_v9 }
 0x209   :  { %v257_v14 = vmul.f32 0.25, %v256_v13  ;;  %v258_v15 = vmul.f32 %v248_v12, %v248_v12  ;;  %v261_v19 = vsub.f32 %v236_v58, %v248_v12 }
 0x20b   :  { %v259_v16 = vsub.f32 %v257_v14, %v258_v15 }
 0x20d   :  { %v260_v17 = vmax.f32 %v259_v16, 0.0  ;;  %v781_v16 = vld [vmem:[#allocation8 + $0x4] ss:$0 sm:$0xff] }
 0x20f   :  { %v262_v18 = vadd.f32 1e-05, %v260_v17 }
 0x211   :  { %1193 = vrsqrt.f32 %v262_v18  ;;  %v782_v18 = vld [vmem:[#allocation8 + $0x5] ss:$0 sm:$0xff] }
 0x21b   :  { %v1194_v20 = vpop.eup %1193 }
 0x21c   :  { %v264_v22 = vmul.f32 %v1194_v20, %v261_v19 }
 0x21e   :  { %v270_v24 = vmul.f32 %v778_v21, %v264_v22  ;;  %v537_v22 = vld [vmem:[#allocation7 + $0x180] sm:$0xff] }
 0x220   :  { %v276_v25 = vadd.f32 %v779_v23, %v270_v24  ;;  %v538_v23 = vld [vmem:[#allocation7 + $0x188] sm:$0xff] }
 0x221   :  { %v1136_v24 = vpack.c.bf16 %v538_v23, %v537_v22  ;;  %v670_v22 = vld [vmem:[#allocation7 + $0x218] sm:$0xff] }
 0x222   :  { %v277_v26 = vmax.f32 %v276_v25, 0.0  ;;  %v539_v25 = vld [vmem:[#allocation7 + $0x190] sm:$0xff] }
 0x224   :  { %953 = vmatmul.mubr.f32.vlgmr.msra.gmra.mrb[2].mxu0 %v277_v26  ;;  %v540_v26 = vld [vmem:[#allocation7 + $0x198] sm:$0xff] }
 0x225   :  { %1022 = vmatprep.mubr.msk.f32.mxu0 %vm1326_vm0, %v1327_v1  ;;  %1137 = vmatpush3.bf16.msra.mxu0 %v1136_v24  ;;  %v1139_v27 = vpack.c.bf16 %v540_v26, %v539_v25  ;;  %v671_v24 = vld [vmem:[#allocation7 + $0x220] sm:$0xff]  ;;  %v672_v25 = vld [vmem:[#allocation7 + $0x228] sm:$0xff] }
 0x226   :  { %1138 = vmatprep.subr.bf16.mxu0 %v1325_v0  ;;  %v1166_v26 = vpack.c.bf16 %v672_v25, %v671_v24 }
 0x229   :  { %1140 = vmatpush3.bf16.msra.mxu0 %v1139_v27  ;;  %v673_v27 = vld [vmem:[#allocation7 + $0x230] sm:$0xff] }
 0x22a   :  { %1141 = vmatprep.subr.bf16.mxu0 %v1325_v0  ;;  %v1169_v29 = vpack.c.bf16 %v674_v28, %v673_v27 }
 0x22d   :  { %1143 = vmatpush3.bf16.msra.mxu0 %v1142_v30  ;;  %v675_v30 = vld [vmem:[#allocation7 + $0x240] sm:$0xff] }
 0x22e   :  { %1144 = vmatprep.subr.bf16.mxu0 %v1325_v0 }
 0x2f7   :  { %v366_v52 = vpop.f32.mrb[2].mxu0 }
 0x2f8   :  { %v367_v53 = vadd.f32 %v780_v51, %v366_v52  ;;  %v954_v54 = vpop.f32.mrb[3].mxu0 }
 0x2fa   :  { %v370_v55 = vsel %vm239_vm2, %v367_v53, 0.0  ;;  %v378_v56 = vmul.f32 %v367_v53, %v367_v53 }
 0x2fb   :  { %v371_v57 = vrot.slane %v370_v55, 4 }
 0x2fc   :  { %v379_v58 = vsel %vm239_vm2, %v378_v56, 0.0 }
 0x2fd   :  { %v372_v59 = vadd.f32 %v371_v57, %v370_v55  ;;  %v380_v60 = vrot.slane %v379_v58, 4 }
 0x2ff   :  { %v373_v61 = vrot.slane %v372_v59, 2  ;;  %v381_v62 = vadd.f32 %v380_v60, %v379_v58 }
 0x301   :  { %v374_v63 = vadd.f32 %v373_v61, %v372_v59  ;;  %v382_v2 = vrot.slane %v381_v62, 2 }
 0x303   :  { %v375_v3 = vrot.slane %v374_v63, 1  ;;  %v383_v4 = vadd.f32 %v382_v2, %v381_v62 }
 0x305   :  { %v376_v5 = vadd.f32 %v375_v3, %v374_v63  ;;  %v384_v6 = vrot.slane %v383_v4, 1 }
 0x307   :  { %v377_v7 = vmul.f32 0.25, %v376_v5  ;;  %v385_v8 = vadd.f32 %v384_v6, %v383_v4 }
 0x309   :  { %v386_v9 = vmul.f32 0.25, %v385_v8  ;;  %v387_v10 = vmul.f32 %v377_v7, %v377_v7  ;;  %v390_v14 = vsub.f32 %v367_v53, %v377_v7 }
 0x30b   :  { %v388_v11 = vsub.f32 %v386_v9, %v387_v10  ;;  %v784_v10 = vld [vmem:[#allocation8 + $0x7] ss:$0 sm:$0xff] }
 0x30d   :  { %v389_v12 = vmax.f32 %v388_v11, 0.0 }
 0x30f   :  { %v391_v13 = vadd.f32 1e-05, %v389_v12  ;;  %v785_v12 = vld [vmem:[#allocation8 + $0x8] ss:$0 sm:$0xff] }
 0x311   :  { %1195 = vrsqrt.f32 %v391_v13 }
 0x31b   :  { %v1196_v15 = vpop.eup %1195 }
 0x31c   :  { %v393_v17 = vmul.f32 %v1196_v15, %v390_v14 }
 0x31e   :  { %v399_v19 = vmul.f32 %v781_v16, %v393_v17  ;;  %v667_v16 = vld [vmem:[#allocation7 + $0x200] sm:$0xff]  ;;  %v668_v17 = vld [vmem:[#allocation7 + $0x208] sm:$0xff] }
 0x320   :  { %v1452_v20 = vadd.f32 %v782_v18, %v399_v19  ;;  %v1160_v18 = vpack.c.bf16 %v668_v17, %v667_v16  ;;  %v669_v19 = vld [vmem:[#allocation7 + $0x210] sm:$0xff] }
 0x321   :  { %v1163_v23 = vpack.c.bf16 %v670_v22, %v669_v19 }
 0x322   :  { %v406_v21 = vmax.f32 %v1452_v20, 0.0 }
 0x324   :  { %988 = vmatmul.mubr.f32.vlgmr.msra.gmra.mrb[2].mxu1 %v406_v21 }
 0x325   :  { %1057 = vmatprep.mubr.msk.f32.mxu1 %vm1326_vm0, %v1327_v1  ;;  %v544_v1 = vld [vmem:[#allocation7 + $0x1b8] sm:$0xff]  ;;  %1161 = vmatpush3.bf16.msra.mxu1 %v1160_v18 }
 0x326   :  { %v1145_v32 = vpack.c.bf16 %v544_v1, %v543_v31  ;;  %1162 = vmatprep.subr.bf16.mxu1 %v1325_v0  ;;  %v676_v31 = vld [vmem:[#allocation7 + $0x248] sm:$0xff] }
 0x327   :  { %v1172_v1 = vpack.c.bf16 %v676_v31, %v675_v30 }
 0x328   :  { %1146 = vmatpush3.bf16.msra.mxu0 %v1145_v32  ;;  %v677_v32 = vld [vmem:[#allocation7 + $0x250] sm:$0xff] }
 0x329   :  { %1147 = vmatprep.subr.bf16.mxu0 %v1325_v0  ;;  %1164 = vmatpush3.bf16.msra.mxu1 %v1163_v23  ;;  %v1175_v34 = vpack.c.bf16 %v678_v33, %v677_v32 }
 0x32a   :  { %1165 = vmatprep.subr.bf16.mxu1 %v1325_v0 }
 0x32c   :  { %1149 = vmatpush3.bf16.msra.mxu0 %v1148_v35  ;;  %v679_v35 = vld [vmem:[#allocation7 + $0x260] sm:$0xff] }
 0x32d   :  { %1150 = vmatprep.subr.bf16.mxu0 %v1325_v0  ;;  %1167 = vmatpush3.bf16.msra.mxu1 %v1166_v26  ;;  %v1178_v37 = vpack.c.bf16 %v680_v36, %v679_v35 }
 0x32e   :  { %1168 = vmatprep.subr.bf16.mxu1 %v1325_v0 }
 0x330   :  { %1152 = vmatpush3.bf16.msra.mxu0 %v1151_v38  ;;  %v681_v38 = vld [vmem:[#allocation7 + $0x270] sm:$0xff] }
 0x331   :  { %1153 = vmatprep.subr.bf16.mxu0 %v1325_v0  ;;  %1170 = vmatpush3.bf16.msra.mxu1 %v1169_v29  ;;  %v1181_v40 = vpack.c.bf16 %v682_v39, %v681_v38 }
 0x332   :  { %1171 = vmatprep.subr.bf16.mxu1 %v1325_v0 }
 0x334   :  { %1155 = vmatpush3.bf16.msra.mxu0 %v1154_v41  ;;  %v786_v41 = vld [vmem:[#allocation8 + $0x9] ss:$0 sm:$0xff] }
 0x335   :  { %1156 = vmatprep.subr.bf16.mxu0 %v1325_v0  ;;  %1173 = vmatpush3.bf16.msra.mxu1 %v1172_v1 }
 0x336   :  { %1174 = vmatprep.subr.bf16.mxu1 %v1325_v0 }
 0x338   :  { %1158 = vmatpush3.bf16.msra.mxu0 %v1157_v44 }
 0x339   :  { %1176 = vmatpush3.bf16.msra.mxu1 %v1175_v34 }
 0x33a   :  { %1177 = vmatprep.subr.bf16.mxu1 %v1325_v0 }
 0x33d   :  { %1179 = vmatpush3.bf16.msra.mxu1 %v1178_v37 }
 0x33e   :  { %1180 = vmatprep.subr.bf16.mxu1 %v1325_v0 }
 0x341   :  { %1182 = vmatpush3.bf16.msra.mxu1 %v1181_v40 }
 0x3f7   :  { %v495_v46 = vpop.f32.mrb[2].mxu1 }
 0x3f8   :  { %v496_v47 = vadd.f32 %v783_v45, %v495_v46  ;;  %v989_v48 = vpop.f32.mrb[3].mxu1 }
 0x3fa   :  { %v499_v49 = vsel %vm239_vm2, %v496_v47, 0.0  ;;  %v507_v50 = vmul.f32 %v496_v47, %v496_v47 }
 0x3fb   :  { %v500_v51 = vrot.slane %v499_v49, 4 }
 0x3fc   :  { %v508_v52 = vsel %vm239_vm2, %v507_v50, 0.0 }
 0x3fd   :  { %v501_v53 = vadd.f32 %v500_v51, %v499_v49  ;;  %v509_v54 = vrot.slane %v508_v52, 4 }
 0x3ff   :  { %v502_v55 = vrot.slane %v501_v53, 2  ;;  %v510_v56 = vadd.f32 %v509_v54, %v508_v52 }
 0x401   :  { %v503_v57 = vadd.f32 %v502_v55, %v501_v53  ;;  %v511_v58 = vrot.slane %v510_v56, 2 }
 0x403   :  { %v504_v59 = vrot.slane %v503_v57, 1  ;;  %v512_v60 = vadd.f32 %v511_v58, %v510_v56 }
 0x405   :  { %v505_v61 = vadd.f32 %v504_v59, %v503_v57  ;;  %v513_v62 = vrot.slane %v512_v60, 1 }
 0x407   :  { %v506_v63 = vmul.f32 0.25, %v505_v61  ;;  %v514_v2 = vadd.f32 %v513_v62, %v512_v60 }
 0x409   :  { %v515_v3 = vmul.f32 0.25, %v514_v2  ;;  %v516_v4 = vmul.f32 %v506_v63, %v506_v63  ;;  %v519_v8 = vsub.f32 %v496_v47, %v506_v63 }
 0x40b   :  { %v517_v5 = vsub.f32 %v515_v3, %v516_v4 }
 0x40d   :  { %v518_v6 = vmax.f32 %v517_v5, 0.0  ;;  %v787_v5 = vld [vmem:[#allocation8 + $0xa] ss:$0 sm:$0xff] }
 0x40f   :  { %v520_v7 = vadd.f32 1e-05, %v518_v6 }
 0x411   :  { %1197 = vrsqrt.f32 %v520_v7  ;;  %v788_v7 = vld [vmem:[#allocation8 + $0xb] ss:$0 sm:$0xff] }
 0x41b   :  { %v1198_v9 = vpop.eup %1197 }
 0x41c   :  { %v522_v11 = vmul.f32 %v1198_v9, %v519_v8 }
 0x41e   :  { %v528_v13 = vmul.f32 %v784_v10, %v522_v11 }
 0x420   :  { %v534_v14 = vadd.f32 %v785_v12, %v528_v13  ;;  %v789_v12 = vld [vmem:[#allocation8 + $0xc] ss:$0 sm:$0xff] }
 0x422   :  { %v535_v15 = vmax.f32 %v534_v14, 0.0 }
 0x424   :  { %1023 = vmatmul.mubr.f32.vlgmr.msra.gmra.mrb[4].mxu0 %v535_v15 }
 0x4f7   :  { %v624_v42 = vpop.f32.mrb[4].mxu0 }
 0x4f8   :  { %v625_v43 = vadd.f32 %v786_v41, %v624_v42  ;;  %v1024_v44 = vpop.f32.mrb[5].mxu0 }
 0x4fa   :  { %v628_v45 = vsel %vm239_vm2, %v625_v43, 0.0  ;;  %v636_v46 = vmul.f32 %v625_v43, %v625_v43 }
 0x4fb   :  { %v629_v47 = vrot.slane %v628_v45, 4 }
 0x4fc   :  { %v637_v48 = vsel %vm239_vm2, %v636_v46, 0.0 }
 0x4fd   :  { %v630_v49 = vadd.f32 %v629_v47, %v628_v45  ;;  %v638_v50 = vrot.slane %v637_v48, 4 }
 0x4ff   :  { %v631_v51 = vrot.slane %v630_v49, 2  ;;  %v639_v52 = vadd.f32 %v638_v50, %v637_v48 }
 0x501   :  { %v632_v53 = vadd.f32 %v631_v51, %v630_v49  ;;  %v640_v54 = vrot.slane %v639_v52, 2 }
 0x503   :  { %v633_v55 = vrot.slane %v632_v53, 1  ;;  %v641_v56 = vadd.f32 %v640_v54, %v639_v52 }
 0x505   :  { %v634_v0 = vadd.f32 %v633_v55, %v632_v53  ;;  %v642_v57 = vrot.slane %v641_v56, 1 }
 0x507   :  { %v635_v58 = vmul.f32 0.25, %v634_v0  ;;  %v643_v59 = vadd.f32 %v642_v57, %v641_v56 }
 0x509   :  { %v644_v60 = vmul.f32 0.25, %v643_v59  ;;  %v645_v61 = vmul.f32 %v635_v58, %v635_v58  ;;  %v648_v3 = vsub.f32 %v625_v43, %v635_v58 }
 0x50b   :  { %v646_v62 = vsub.f32 %v644_v60, %v645_v61 }
 0x50d   :  { %v647_v63 = vmax.f32 %v646_v62, 0.0 }
 0x50f   :  { %v649_v2 = vadd.f32 1e-05, %v647_v63 }
 0x511   :  { %1199 = vrsqrt.f32 %v649_v2 }
 0x51b   :  { %v1200_v4 = vpop.eup %1199 }
 0x51c   :  { %v651_v6 = vmul.f32 %v1200_v4, %v648_v3 }
 0x51e   :  { %v657_v8 = vmul.f32 %v787_v5, %v651_v6 }
 0x520   :  { %v663_v9 = vadd.f32 %v788_v7, %v657_v8 }
 0x522   :  { %v664_v10 = vadd.f32 %v663_v9, %v406_v21 }
 0x524   :  { %v665_v11 = vmax.f32 %v664_v10, 0.0 }
 0x526   :  { %1058 = vmatmul.mubr.f32.vlgmr.msra.gmra.mrb[4].mxu1 %v665_v11 }
 0x5f9   :  { %v754_v13 = vpop.f32.mrb[4].mxu1 }
 0x5fa   :  { %v755_v14 = vadd.f32 %v789_v12, %v754_v13  ;;  %v1059_v15 = vpop.f32.mrb[5].mxu1 }
 0x5fc   :  { %758 = vst [vmem:[#allocation10] sm:$0xf] %v755_v14 }
 0x5fd   :  { %1300 = shalt.err (!%p1297_p8)
}
 0x5fe   :  { %s1301_s1 = scalar_lea.hbm %s1495_s4, 64 }
 0x5ff   :  { %p1302_p9 = scmp.ne.s32.totalorder %s1495_s4, %s1301_s1  ;;  %p1305_p10 = scmp.lt.u32.totalorder %s1301_s1, %s1495_s4 }
 0x601   :  { %p1307_p11 = pnand %p1305_p10, %p1302_p9 }
 0x603   :  { %1310 = shalt.err (!%p1307_p11)
}
 0x604   :  { %768 = dma.vmem_to_hbm [thread:$0]  %s766_s25, 64, %s1495_s4, [#allocation4]  }
 0x605   :  { %1317 = dma.done.wait [#allocation4], 64  }
 0x606   :  { %1318 = vsyncadd [#allocation4], 4294967232 }
 0x607   :  { %772 = vsyncpa [#allocation3], 1 }
 0x608   :  { %773 = vsyncpa [#allocation6], 1 }
 0x609   :  { %774 = vsyncpa [#allocation9], 1 }
 0x60a   :  { %775 = vsyncpa [#allocation4], 1 }

</bundles_post_ra>
